<compile_context>
chip_gen: v5e
topology: v5e:2x2
jax: 0.10.0
libtpu: 0.0.40
codegen_flags: <defaults>
</compile_context>

<pallas_src>
import jax
import jax.numpy as jnp
from jax import lax
from jax.experimental import pallas as pl
from jax.experimental.pallas import tpu as pltpu

# ----------------------- synthetic configuration -----------------------
B = 2              # batch
C = 4              # input_channel
H = W = 16         # input_size
N_CLASS = 10       # n_class
N_BRANCHES = 2     # n_branches
F_HID = 8          # hidden conv channels of every branch/gate/trunk net
GATE_THRESHOLD = 0.0   # args.gate_threshold (gate_type == 'net')
KH = KW = 3
K1 = C * KH * KW   # 36
HW = H * W         # 256

# fused / padded sizes (lane-aligned to 128 for clean MXU tiles on all gens)
N_HEADS = 2 * N_BRANCHES + 1          # branch0, branch1, gate0, gate1, trunk
F_TOTAL = N_HEADS * F_HID             # 40
KP = 128                              # padded contraction dim (K1+1 -> 128)
FP = 128                              # padded fused hidden width (F_TOTAL+1 -> 128)
OP = 128                              # padded, lane-dense output slab width
BP = 8                                # sublane-padded batch rows (full vreg store)

BIAS_COL = K1                         # patch column carrying constant 1.0 (conv bias)
BIAS_LANE = F_TOTAL                   # hidden lane carrying constant 1.0 (FC bias)

# column layout of the packed (BP, OP) output slab
OUT_BRANCH = 0                               # [0, 20)  branch logits
OUT_GATE = N_BRANCHES * N_CLASS              # [20, 22) gate logits
OUT_TRUNK = OUT_GATE + N_BRANCHES            # [22, 32) trunk logits
OUT_SEL = OUT_TRUNK + N_CLASS                # [32, 35) selected masks (0/1)
OUT_EXIT = OUT_SEL + (N_BRANCHES + 1)        # [35]     exit id


# ----------------------- fused Pallas kernel -----------------------
def fused_kernel(patches_ref, wconv_ref, wfc_ref, out_ref):
    # Conv-as-im2col for ALL heads at once: (B*HW, KP)bf16 x (KP, FP)bf16 on the
    # MXU with f32 accumulation.  Conv bias enters via the ones-column of the
    # patch matrix, so only a ReLU is needed afterwards (f32, VPU).
    h = jnp.dot(patches_ref[...], wconv_ref[...],
                preferred_element_type=jnp.float32)                 # (B*HW, FP)
    h = jnp.maximum(h, 0.0)

    # Global pool per batch element: one reshape (tile aligned, HW=256) + one
    # sublane reduction.  The 1/HW factor is pre-folded into wfc, so sum only.
    pooled = jnp.sum(h.reshape(B, HW, FP), axis=1)                  # (B, FP) f32
    pooled = jnp.concatenate(
        [pooled, jnp.zeros((BP - B, FP), jnp.float32)], axis=0)     # (BP, FP)

    # Block-diagonal FC of all heads -> one lane-dense packed logits slab.
    # FC bias enters via the bias-carry lane (h[:, BIAS_LANE] == 1 after ReLU).
    logits = jnp.dot(pooled.astype(jnp.bfloat16), wfc_ref[...],
                     preferred_element_type=jnp.float32)            # (BP, OP)

    # Fused gate routing: first branch whose gate logit >= threshold wins,
    # otherwise route to the trunk (exit id -1).  Narrow (BP,1) arithmetic.
    remaining = jnp.ones((BP, 1), jnp.float32)
    exit_f = jnp.full((BP, 1), -1.0, jnp.float32)
    for i in range(N_BRANCHES):
        gi = logits[:, OUT_GATE + i:OUT_GATE + i + 1]               # (BP, 1)
        sel = remaining * (gi >= GATE_THRESHOLD).astype(jnp.float32)
        exit_f = exit_f + sel * jnp.float32(i + 1)                  # -1 -> i when selected
        remaining = remaining - sel

    # Single combined select writes the 3 one-hot "selected" columns and the
    # exit-id column into the zero-padded tail of the slab (O(1) full-vreg ops).
    slot = jnp.where(exit_f < 0.0, jnp.float32(N_BRANCHES), exit_f)  # 0..n_branches
    col = lax.broadcasted_iota(jnp.int32, (BP, OP), 1)
    onehot = (col.astype(jnp.float32) ==
              (slot + jnp.float32(OUT_SEL))).astype(jnp.float32)     # (BP, OP)
    tail = jnp.where(col == OUT_EXIT, exit_f, onehot)
    out_ref[...] = jnp.where(col >= OUT_SEL, tail, logits)           # full (8,128) vst


# ----------------------- wrapper (plain JAX glue) -----------------------
def make_patches(x):
    """im2col with column ordering c*9 + kh*3 + kw, plus a trailing ones column
    for the folded conv bias, zero-padded to KP lanes, emitted in bf16.
    Built from pad/slice/reshape/concat only so XLA can fuse it into the
    pallas_call operand (allow_input_fusion)."""
    xp = jnp.pad(x, ((0, 0), (0, 0), (1, 1), (1, 1)))               # (B, C, H+2, W+2)
    taps = jnp.stack([xp[:, :, dh:dh + H, dw:dw + W]
                      for dh in range(KH) for dw in range(KW)],
                     axis=2)                                         # (B, C, 9, H, W)
    p = taps.transpose(0, 3, 4, 1, 2).reshape(B * HW, K1)           # (B*HW, K1)
    ones = jnp.ones((B * HW, 1), p.dtype)
    p = jnp.concatenate([p, ones], axis=1)                          # (B*HW, K1+1)
    p = jnp.pad(p, ((0, 0), (0, KP - K1 - 1)))                      # (B*HW, KP)
    return p.astype(jnp.bfloat16)


def init_net_params(key, out_dim):
    k1, k2, k3, k4 = jax.random.split(key, 4)
    wconv = 0.1 * jax.random.normal(k1, (K1, F_HID), jnp.float32)
    bconv = 0.1 * jax.random.normal(k2, (1, F_HID), jnp.float32)
    wfc = 0.1 * jax.random.normal(k3, (F_HID, out_dim), jnp.float32)
    bfc = 0.1 * jax.random.normal(k4, (1, out_dim), jnp.float32)
    return (wconv, bconv, wfc, bfc)


def pack_params(params):
    """Concatenate all heads into zero-padded fused bf16 weight slabs (once).
    Biases are folded into the padded lanes; the mean-pool 1/HW is folded into
    the FC weights (kernel uses a sum)."""
    heads = list(params['branch']) + list(params['gate']) + [params['trunk']]
    out_offs = ([OUT_BRANCH + i * N_CLASS for i in range(N_BRANCHES)]
                + [OUT_GATE + i for i in range(N_BRANCHES)]
                + [OUT_TRUNK])
    wconv_p = jnp.zeros((KP, FP), jnp.float32)
    wfc_p = jnp.zeros((FP, OP), jnp.float32)
    for h_idx, ((wc, bc, wf, bf), off) in enumerate(zip(heads, out_offs)):
        f0 = h_idx * F_HID
        out_dim = wf.shape[1]
        wconv_p = wconv_p.at[:K1, f0:f0 + F_HID].set(wc)
        wconv_p = wconv_p.at[BIAS_COL, f0:f0 + F_HID].set(bc[0])    # conv bias row
        wfc_p = wfc_p.at[f0:f0 + F_HID, off:off + out_dim].set(wf)
        wfc_p = wfc_p.at[BIAS_LANE, off:off + out_dim].set(bf[0])   # FC bias row
    wconv_p = wconv_p.at[BIAS_COL, BIAS_LANE].set(1.0)  # carry 1.0 through ReLU
    wfc_p = wfc_p / HW                                  # fold mean-pool scale
    return wconv_p.astype(jnp.bfloat16), wfc_p.astype(jnp.bfloat16)


_COST = pl.CostEstimate(
    flops=2 * (B * HW) * KP * FP + 2 * BP * FP * OP,
    transcendentals=0,
    bytes_accessed=(B * HW * KP + KP * FP + FP * OP) * 2 + BP * OP * 4,
)


@jax.jit
def deeptrunk_forward(x, wconv_p, wfc_p):
    """Mirrors MyDeepTrunkNet.forward: returns (x_out, x_gate, selected, exit_ids)."""
    patches = make_patches(x)
    slab = pl.pallas_call(
        fused_kernel,
        out_shape=jax.ShapeDtypeStruct((BP, OP), jnp.float32),
        compiler_params=pltpu.CompilerParams(
            allow_input_fusion=[True, False, False]),
        cost_estimate=_COST,
    )(patches, wconv_p, wfc_p)
    slab = slab[:B]

    branch_logits = [slab[:, OUT_BRANCH + i * N_CLASS: OUT_BRANCH + (i + 1) * N_CLASS]
                     for i in range(N_BRANCHES)]
    trunk_logits = slab[:, OUT_TRUNK:OUT_TRUNK + N_CLASS]
    x_out = jnp.stack(branch_logits + [trunk_logits], axis=1)       # (B, nb+1, n_class)
    x_gate = slab[:, OUT_GATE:OUT_GATE + N_BRANCHES][:, :, None]    # (B, nb, 1)
    selected = [slab[:, OUT_SEL + i] > 0.5 for i in range(N_BRANCHES + 1)]
    exit_ids = slab[:, OUT_EXIT].astype(jnp.int32)
    return x_out, x_gate, selected, exit_ids


# ----------------------- pure-JAX reference for validation -----------------------
def reference_net(x, wconv, bconv, wfc, bfc):
    f = wconv.shape[1]
    w_oihw = wconv.T.reshape(f, C, KH, KW)
    y = lax.conv_general_dilated(x, w_oihw, (1, 1), 'SAME',
                                 dimension_numbers=('NCHW', 'OIHW', 'NCHW'))
    y = jnp.maximum(y + bconv.reshape(1, f, 1, 1), 0.0)
    pooled = y.mean(axis=(2, 3))
    return pooled @ wfc + bfc


def reference_forward(x, params):
    x_out, x_gate, selected = [], [], []
    remaining = jnp.ones((x.shape[0],), jnp.bool_)
    exit_ids = jnp.zeros((x.shape[0],), jnp.int32)
    for i in range(N_BRANCHES):
        x_out.append(reference_net(x, *params['branch'][i]))
        g = reference_net(x, *params['gate'][i])
        x_gate.append(g)
        sel = jnp.logical_and(g[:, 0] >= GATE_THRESHOLD, remaining)
        exit_ids = jnp.where(sel, i, exit_ids)
        remaining = jnp.logical_and(remaining, jnp.logical_not(sel))
        selected.append(sel)
    exit_ids = jnp.where(remaining, -1, exit_ids)
    selected.append(remaining)
    x_out.append(reference_net(x, *params['trunk']))
    return jnp.stack(x_out, axis=1), jnp.stack(x_gate, axis=1), selected, exit_ids


# ----------------------- main -----------------------
if __name__ == "__main__":
    key = jax.random.PRNGKey(0)
    keys = jax.random.split(key, 2 * N_BRANCHES + 2)
    x = jax.random.normal(keys[0], (B, C, H, W), jnp.float32)
    params = {
        'branch': [init_net_params(keys[1 + i], N_CLASS) for i in range(N_BRANCHES)],
        'gate': [init_net_params(keys[1 + N_BRANCHES + i], 1) for i in range(N_BRANCHES)],
        'trunk': init_net_params(keys[1 + 2 * N_BRANCHES], N_CLASS),
    }
    wconv_p, wfc_p = pack_params(params)

    x_out, x_gate, selected, exit_ids = deeptrunk_forward(x, wconv_p, wfc_p)
    jax.block_until_ready((x_out, x_gate, selected, exit_ids))

    r_out, r_gate, r_sel, r_exit = reference_forward(x, params)
    # bf16 matmul operands vs f32 reference -> loose-but-honest tolerances.
    assert jnp.allclose(x_out, r_out, rtol=2e-2, atol=2e-2)
    assert jnp.allclose(x_gate, r_gate, rtol=2e-2, atol=2e-2)
    # only compare discrete routing decisions away from the numerical boundary
    if bool(jnp.all(jnp.abs(r_gate[:, :, 0] - GATE_THRESHOLD) > 1e-2)):
        for a, b in zip(selected, r_sel):
            assert bool(jnp.all(a == b))
        assert bool(jnp.all(exit_ids == r_exit))

    print("KERNEL_OK")
</pallas_src>

<mosaic_0001>
module attributes {stable_mosaic.version = 11 : i64} {
  func.func @fused_kernel(%arg0: memref<512x128xbf16, #tpu.memory_space<vmem>>, %arg1: memref<128x128xbf16, #tpu.memory_space<vmem>>, %arg2: memref<128x128xbf16, #tpu.memory_space<vmem>>, %arg3: memref<8x128xf32, #tpu.memory_space<vmem>>) attributes {dimension_semantics = [], scalar_prefetch = 0 : i64, scratch_operands = 0 : i64, tpu.core_type = #tpu.core_type<tc>} {
    %c0 = arith.constant 0 : index
    %c0_0 = arith.constant 0 : index
    %0 = vector.load %arg0[%c0, %c0_0] : memref<512x128xbf16, #tpu.memory_space<vmem>>, vector<512x128xbf16>
    %c0_1 = arith.constant 0 : index
    %c0_2 = arith.constant 0 : index
    %1 = vector.load %arg1[%c0_1, %c0_2] : memref<128x128xbf16, #tpu.memory_space<vmem>>, vector<128x128xbf16>
    %cst = arith.constant dense<0.000000e+00> : vector<512x128xf32>
    %2 = tpu.matmul %0, %1, %cst {dimension_numbers = #tpu.dot_dimension_numbers<[1], [0], [0], [1], [0, 0, 1, 1], [], []>} : vector<512x128xbf16>, vector<128x128xbf16>, vector<512x128xf32> -> vector<512x128xf32>
    %cst_3 = arith.constant 0.000000e+00 : f32
    %3 = vector.broadcast %cst_3 : f32 to vector<512x128xf32>
    %4 = arith.maximumf %2, %3 : vector<512x128xf32>
    %5 = vector.shape_cast %4 : vector<512x128xf32> to vector<2x256x128xf32>
    %cst_4 = arith.constant dense<0.000000e+00> : vector<2x128xf32>
    %6 = vector.multi_reduction <add>, %5, %cst_4 [1] : vector<2x256x128xf32> to vector<2x128xf32>
    %cst_5 = arith.constant 0.000000e+00 : f32
    %7 = vector.broadcast %cst_5 : f32 to vector<6x128xf32>
    %8 = tpu.concatenate %6, %7 in 0 : vector<2x128xf32>, vector<6x128xf32> -> vector<8x128xf32>
    %9 = arith.truncf %8 : vector<8x128xf32> to vector<8x128xbf16>
    %c0_6 = arith.constant 0 : index
    %c0_7 = arith.constant 0 : index
    %10 = vector.load %arg2[%c0_6, %c0_7] : memref<128x128xbf16, #tpu.memory_space<vmem>>, vector<128x128xbf16>
    %cst_8 = arith.constant dense<0.000000e+00> : vector<8x128xf32>
    %11 = tpu.matmul %9, %10, %cst_8 {dimension_numbers = #tpu.dot_dimension_numbers<[1], [0], [0], [1], [0, 0, 1, 1], [], []>} : vector<8x128xbf16>, vector<128x128xbf16>, vector<8x128xf32> -> vector<8x128xf32>
    %cst_9 = arith.constant 1.000000e+00 : f32
    %12 = vector.broadcast %cst_9 : f32 to vector<8x1xf32>
    %cst_10 = arith.constant -1.000000e+00 : f32
    %13 = vector.broadcast %cst_10 : f32 to vector<8x1xf32>
    %14 = vector.extract_strided_slice %11 {offsets = [0, 20], sizes = [8, 1], strides = [1, 1]} : vector<8x128xf32> to vector<8x1xf32>
    %cst_11 = arith.constant 0.000000e+00 : f32
    %15 = vector.broadcast %cst_11 : f32 to vector<8x1xf32>
    %16 = arith.cmpf oge, %14, %15 : vector<8x1xf32>
    %17 = arith.extui %16 : vector<8x1xi1> to vector<8x1xi32>
    %18 = arith.sitofp %17 : vector<8x1xi32> to vector<8x1xf32>
    %19 = arith.mulf %12, %18 : vector<8x1xf32>
    %cst_12 = arith.constant 1.000000e+00 : f32
    %20 = vector.broadcast %cst_12 : f32 to vector<8x1xf32>
    %21 = arith.mulf %19, %20 : vector<8x1xf32>
    %22 = arith.addf %13, %21 : vector<8x1xf32>
    %23 = arith.subf %12, %19 : vector<8x1xf32>
    %24 = vector.extract_strided_slice %11 {offsets = [0, 21], sizes = [8, 1], strides = [1, 1]} : vector<8x128xf32> to vector<8x1xf32>
    %cst_13 = arith.constant 0.000000e+00 : f32
    %25 = vector.broadcast %cst_13 : f32 to vector<8x1xf32>
    %26 = arith.cmpf oge, %24, %25 : vector<8x1xf32>
    %27 = arith.extui %26 : vector<8x1xi1> to vector<8x1xi32>
    %28 = arith.sitofp %27 : vector<8x1xi32> to vector<8x1xf32>
    %29 = arith.mulf %23, %28 : vector<8x1xf32>
    %cst_14 = arith.constant 2.000000e+00 : f32
    %30 = vector.broadcast %cst_14 : f32 to vector<8x1xf32>
    %31 = arith.mulf %29, %30 : vector<8x1xf32>
    %32 = arith.addf %22, %31 : vector<8x1xf32>
    %cst_15 = arith.constant 0.000000e+00 : f32
    %33 = vector.broadcast %cst_15 : f32 to vector<8x1xf32>
    %34 = arith.cmpf olt, %32, %33 : vector<8x1xf32>
    %cst_16 = arith.constant 2.000000e+00 : f32
    %35 = vector.broadcast %cst_16 : f32 to vector<8x1xf32>
    %36 = arith.select %34, %35, %32 : vector<8x1xi1>, vector<8x1xf32>
    %37 = tpu.iota {dimensions = array<i32: 1>} : vector<8x128xi32>
    %38 = arith.sitofp %37 : vector<8x128xi32> to vector<8x128xf32>
    %cst_17 = arith.constant 3.200000e+01 : f32
    %39 = vector.broadcast %cst_17 : f32 to vector<8x1xf32>
    %40 = arith.addf %36, %39 : vector<8x1xf32>
    %41 = vector.broadcast %40 : vector<8x1xf32> to vector<8x128xf32>
    %42 = arith.cmpf oeq, %38, %41 : vector<8x128xf32>
    %43 = arith.extui %42 : vector<8x128xi1> to vector<8x128xi32>
    %44 = arith.sitofp %43 : vector<8x128xi32> to vector<8x128xf32>
    %c35_i32 = arith.constant 35 : i32
    %45 = vector.broadcast %c35_i32 : i32 to vector<8x128xi32>
    %46 = arith.cmpi eq, %37, %45 : vector<8x128xi32>
    %47 = vector.shape_cast %32 : vector<8x1xf32> to vector<8x1xf32>
    %48 = vector.broadcast %47 : vector<8x1xf32> to vector<8x128xf32>
    %49 = arith.select %46, %48, %44 : vector<8x128xi1>, vector<8x128xf32>
    %c32_i32 = arith.constant 32 : i32
    %50 = vector.broadcast %c32_i32 : i32 to vector<8x128xi32>
    %51 = arith.cmpi sge, %37, %50 : vector<8x128xi32>
    %52 = arith.select %51, %49, %11 : vector<8x128xi1>, vector<8x128xf32>
    %c0_18 = arith.constant 0 : index
    %c0_19 = arith.constant 0 : index
    %53 = vector.load %arg3[%c0_18, %c0_19] : memref<8x128xf32, #tpu.memory_space<vmem>>, vector<8x128xf32>
    tpu.vector_store %arg3[%c0_18, %c0_19], %52 {strides = array<i32>} : memref<8x128xf32, #tpu.memory_space<vmem>>, vector<8x128xf32>,
    return
  }
}

</mosaic_0001>

<bundles_post_ra>
// kernel: deeptrunk_forward.2
= control target key start
LH: loop header
LB: loop body
LE: loop exit
PB: predicated region body
PF: predicated region fallthrough
CT: control target
= control target key end

     0   :  { %s4108_s0 = inlined_call_operand.vmem [shape: bf16[128,128], index: 0, kind: input, shape index: {}]   ;;  %s4109_s1 = inlined_call_operand.vmem [shape: bf16[128,128], index: 1, kind: input, shape index: {}]   ;;  %s4110_s2 = inlined_call_operand.<no memory space> [shape: s32[], index: 2, kind: input, shape index: {}]   ;;  %s4111_s3 = inlined_call_operand.vmem [shape: bf16[512,36], index: 3, kind: input, shape index: {}]   ;;  %s4112_s4 = inlined_call_operand.<no memory space> [shape: bf16[], index: 4, kind: input, shape index: {}]   ;;  %s4113_s5 = inlined_call_operand.<no memory space> [shape: bf16[], index: 5, kind: input, shape index: {}]   ;;  %s4114_s6 = inlined_call_operand.vmem [shape: f32[8,128], index: 6, kind: output, shape index: {}]  }
   0x1   :  { %v11_v0 = vstv %s4110_s2  ;;  %v12_v1 = vstv %s4112_s4  ;;  %v17_v2 = vstv %s4113_s5 }
   0x2   :  { %v3466_v3 = vunpack.i.l.bf16 %v12_v1  ;;  %v3468_v4 = vunpack.i.l.bf16 %v17_v2 }
   0x3   :  { %v3381_v5 = vld [vmem:[%s4108_s0 + $0x38] sm:$0xff]  ;;  %v40_v6 = vlaneseq  ;;  %v3380_v7 = vld [vmem:[%s4108_s0 + $0x30] sm:$0xff]  ;;  %v37_v8 = vld [vmem:[%s4111_s3] sm:$0xff]   ;;  %vm2959_vm2 = vcmask 1041409   ;;  %vm2962_vm3 = vcmask 1041408  }
   0x4   :  { %2650 = vmatpush.bf16.msra.mxu0 %v3381_v5  ;;  %3391 = vmatpush.bf16.msra.mxu2 %v3381_v5  ;;  %v38_v10 = vunpack.c.l.bf16 %v37_v8  ;;  %v73_v11 = vunpack.c.h.bf16 %v37_v8  ;;  %v3109_v12 = vld [vmem:[%s4111_s3 + $0x70] sm:$0xff]   ;;  %v3083_v13 = vld [vmem:[%s4111_s3 + $0x8] sm:$0xff]   ;;  %v3111_v14 = vld [vmem:[%s4111_s3 + $0x78] sm:$0xff]  }
   0x5   :  { %v3479_v9 = vand.u32 127, %v40_v6  ;;  %3392 = vmatpush.bf16.msra.mxu3 %v3381_v5  ;;  %3390 = vmatpush.bf16.msra.mxu1 %v3381_v5  ;;  %v1045_v16 = vunpack.c.l.bf16 %v3109_v12  ;;  %v1081_v17 = vunpack.c.h.bf16 %v3109_v12  ;;  %v109_v20 = vunpack.c.l.bf16 %v3083_v13  ;;  %v3379_v22 = vld [vmem:[%s4108_s0 + $0x28] sm:$0xff]  ;;  %v3378_v39 = vld [vmem:[%s4108_s0 + $0x20] sm:$0xff]  ;;  %v3127_v47 = vld [vmem:[%s4111_s3 + $0xb8] sm:$0xff]  }
   0x6   :  { %v145_v21 = vunpack.c.h.bf16 %v3083_v13  ;;  %v1117_v26 = vunpack.c.l.bf16 %v3111_v14  ;;  %v1153_v43 = vunpack.c.h.bf16 %v3111_v14  ;;  %v3377_v48 = vld [vmem:[%s4108_s0 + $0x18] sm:$0xff]  ;;  %v1693_v50 = vunpack.c.l.bf16 %v3127_v47  ;;  %v3085_v56 = vld [vmem:[%s4111_s3 + $0x10] sm:$0xff]   ;;  %v3113_v57 = vld [vmem:[%s4111_s3 + $0x80] sm:$0xff]  }
   0x7   :  { %vm43_vm0 = vcmp.lt.s32.totalorder %v3479_v9, 36  ;;  %vm3492_vm1 = vcmp.lt.s32.totalorder %v3479_v9, %v11_v0  ;;  %v1729_v51 = vunpack.c.h.bf16 %v3127_v47  ;;  %v3376_v58 = vld [vmem:[%s4108_s0 + $0x10] sm:$0xff]  ;;  %v181_v61 = vunpack.c.l.bf16 %v3085_v56  ;;  %vm3337_vm4 = vmpackc.low %vm2962_vm3, %vm2962_vm3 }
   0x8   :  { %v44_v18 = vsel %vm43_vm0, %v38_v10, %v3466_v3  ;;  %v79_v19 = vsel %vm43_vm0, %v73_v11, %v3466_v3  ;;  %2651 = vmatpush.bf16.msra.mxu0 %v3380_v7  ;;  %3394 = vmatpush.bf16.msra.mxu2 %v3380_v7  ;;  %v1051_v25 = vsel %vm43_vm0, %v1045_v16, %v3466_v3  ;;  %v217_v62 = vunpack.c.h.bf16 %v3085_v56  ;;  %v3375_v10 = vld [vmem:[%s4108_s0 + $0x8] sm:$0xff] }
   0x9   :  { %v56_v23 = vsel %vm3492_vm1, %v44_v18, %v3468_v4  ;;  %v91_v24 = vsel %vm3492_vm1, %v79_v19, %v3468_v4  ;;  %v1063_v29 = vsel %vm3492_vm1, %v1051_v25, %v3468_v4  ;;  %v1087_v30 = vsel %vm43_vm0, %v1081_v17, %v3466_v3  ;;  %3395 = vmatpush.bf16.msra.mxu3 %v3380_v7  ;;  %v3374_v18 = vld [vmem:[%s4108_s0] sm:$0xff] }
   0xa   :  { %v58_v27 = vpack.c.bf16 0.0, %v56_v23  ;;  %v94_v28 = vpack.c.bf16 0.0, %v91_v24  ;;  %3393 = vmatpush.bf16.msra.mxu1 %v3380_v7  ;;  %v1066_v31 = vpack.c.bf16 0.0, %v1063_v29  ;;  %v1099_v32 = vsel %vm3492_vm1, %v1087_v30, %v3468_v4  ;;  %v3087_v29 = vld [vmem:[%s4111_s3 + $0x18] sm:$0xff]   ;;  %v3115_v30 = vld [vmem:[%s4111_s3 + $0x88] sm:$0xff]  }
   0xb   :  { %v115_v33 = vsel %vm43_vm0, %v109_v20, %v3466_v3  ;;  %v151_v34 = vsel %vm43_vm0, %v145_v21, %v3466_v3  ;;  %v1102_v35 = vpack.c.bf16 0.0, %v1099_v32  ;;  %v1123_v38 = vsel %vm43_vm0, %v1117_v26, %v3466_v3  ;;  %v3129_v21 = vld [vmem:[%s4111_s3 + $0xc0] sm:$0xff]  }
   0xc   :  { %61 = vst [vmem:[#allocation7] sm:$0xf] %v58_v27  ;;  %v127_v36 = vsel %vm3492_vm1, %v115_v33, %v3468_v4  ;;  %v163_v37 = vsel %vm3492_vm1, %v151_v34, %v3468_v4  ;;  %2652 = vmatpush.bf16.msra.mxu0 %v3379_v22  ;;  %3397 = vmatpush.bf16.msra.mxu2 %v3379_v22  ;;  %v1189_v63 = vunpack.c.l.bf16 %v3113_v57  ;;  %v1225_v0 = vunpack.c.h.bf16 %v3113_v57 }
   0xd   :  { %97 = vst [vmem:[#allocation7 + $0x4] sm:$0xf] %v94_v28  ;;  %v130_v40 = vpack.c.bf16 0.0, %v127_v36  ;;  %v166_v41 = vpack.c.bf16 0.0, %v163_v37  ;;  %v1135_v42 = vsel %vm3492_vm1, %v1123_v38, %v3468_v4  ;;  %3398 = vmatpush.bf16.msra.mxu3 %v3379_v22  ;;  %v1159_v45 = vsel %vm43_vm0, %v1153_v43, %v3466_v3 }
   0xe   :  { %1069 = vst [vmem:[#allocation7 + $0x70] sm:$0xf] %v1066_v31  ;;  %v1138_v44 = vpack.c.bf16 0.0, %v1135_v42  ;;  %3396 = vmatpush.bf16.msra.mxu1 %v3379_v22  ;;  %v1171_v46 = vsel %vm3492_vm1, %v1159_v45, %v3468_v4  ;;  %v1699_v52 = vsel %vm43_vm0, %v1693_v50, %v3466_v3  ;;  %v1735_v53 = vsel %vm43_vm0, %v1729_v51, %v3466_v3 }
   0xf   :  { %1105 = vst [vmem:[#allocation7 + $0x74] sm:$0xf] %v1102_v35  ;;  %v1174_v49 = vpack.c.bf16 0.0, %v1171_v46  ;;  %v1711_v54 = vsel %vm3492_vm1, %v1699_v52, %v3468_v4  ;;  %v1747_v55 = vsel %vm3492_vm1, %v1735_v53, %v3468_v4  ;;  %v187_v1 = vsel %vm43_vm0, %v181_v61, %v3466_v3 }
  0x10   :  { %133 = vst [vmem:[#allocation7 + $0x8] sm:$0xf] %v130_v40  ;;  %2653 = vmatpush.bf16.msra.mxu0 %v3378_v39  ;;  %3400 = vmatpush.bf16.msra.mxu2 %v3378_v39  ;;  %v1714_v59 = vpack.c.bf16 0.0, %v1711_v54  ;;  %v1750_v60 = vpack.c.bf16 0.0, %v1747_v55  ;;  %v223_v2 = vsel %vm43_vm0, %v217_v62, %v3466_v3  ;;  %v199_v5 = vsel %vm3492_vm1, %v187_v1, %v3468_v4 }
  0x11   :  { %169 = vst [vmem:[#allocation7 + $0xc] sm:$0xf] %v166_v41  ;;  %3401 = vmatpush.bf16.msra.mxu3 %v3378_v39  ;;  %v235_v6 = vsel %vm3492_vm1, %v223_v2, %v3468_v4  ;;  %v1195_v7 = vsel %vm43_vm0, %v1189_v63, %v3466_v3  ;;  %v1231_v8 = vsel %vm43_vm0, %v1225_v0, %v3466_v3  ;;  %v202_v11 = vpack.c.bf16 0.0, %v199_v5 }
  0x12   :  { %1141 = vst [vmem:[#allocation7 + $0x78] sm:$0xf] %v1138_v44  ;;  %3399 = vmatpush.bf16.msra.mxu1 %v3378_v39  ;;  %v238_v12 = vpack.c.bf16 0.0, %v235_v6  ;;  %v1207_v13 = vsel %vm3492_vm1, %v1195_v7, %v3468_v4  ;;  %v1243_v14 = vsel %vm3492_vm1, %v1231_v8, %v3468_v4  ;;  %v1765_v23 = vunpack.c.l.bf16 %v3129_v21  ;;  %v3089_v6 = vld [vmem:[%s4111_s3 + $0x20] sm:$0xff]   ;;  %v3117_v7 = vld [vmem:[%s4111_s3 + $0x90] sm:$0xff]  }
  0x13   :  { %1177 = vst [vmem:[#allocation7 + $0x7c] sm:$0xf] %v1174_v49  ;;  %v1210_v16 = vpack.c.bf16 0.0, %v1207_v13  ;;  %v1246_v17 = vpack.c.bf16 0.0, %v1243_v14  ;;  %v1801_v24 = vunpack.c.h.bf16 %v3129_v21  ;;  %v253_v33 = vunpack.c.l.bf16 %v3087_v29  ;;  %v3097_v49 = vld [vmem:[%s4111_s3 + $0x40] sm:$0xff]  }
  0x14   :  { %2654 = vmatpush.bf16.msra.mxu0 %v3377_v48  ;;  %3403 = vmatpush.bf16.msra.mxu2 %v3377_v48  ;;  %1717 = vst [vmem:[#allocation7 + $0xb8] sm:$0xf] %v1714_v59  ;;  %v3342_v19 = vld [vmem:[#allocation7] sm:$0xff]  ;;  %v1771_v25 = vsel %vm43_vm0, %v1765_v23, %v3466_v3  ;;  %v289_v34 = vunpack.c.h.bf16 %v3087_v29  ;;  %v1261_v35 = vunpack.c.l.bf16 %v3115_v30  ;;  %v1297_v36 = vunpack.c.h.bf16 %v3115_v30  ;;  %v3099_v29 = vld [vmem:[%s4111_s3 + $0x48] sm:$0xff]  }
  0x15   :  { %3404 = vmatpush.bf16.msra.mxu3 %v3377_v48  ;;  %1753 = vst [vmem:[#allocation7 + $0xbc] sm:$0xf] %v1750_v60  ;;  %v1807_v26 = vsel %vm43_vm0, %v1801_v24, %v3466_v3  ;;  %v1783_v27 = vsel %vm3492_vm1, %v1771_v25, %v3468_v4  ;;  %v259_v37 = vsel %vm43_vm0, %v253_v33, %v3466_v3  ;;  %v613_v50 = vunpack.c.l.bf16 %v3097_v49 }
  0x16   :  { %3402 = vmatpush.bf16.msra.mxu1 %v3377_v48  ;;  %205 = vst [vmem:[#allocation7 + $0x10] sm:$0xf] %v202_v11  ;;  %v3356_v20 = vld [vmem:[#allocation7 + $0x70] sm:$0xff]  ;;  %v1819_v28 = vsel %vm3492_vm1, %v1807_v26, %v3468_v4  ;;  %v1786_v31 = vpack.c.bf16 0.0, %v1783_v27  ;;  %v295_v38 = vsel %vm43_vm0, %v289_v34, %v3466_v3  ;;  %v271_v39 = vsel %vm3492_vm1, %v259_v37, %v3468_v4 }
  0x17   :  { %241 = vst [vmem:[#allocation7 + $0x14] sm:$0xf] %v238_v12  ;;  %v1822_v32 = vpack.c.bf16 0.0, %v1819_v28  ;;  %v307_v40 = vsel %vm3492_vm1, %v295_v38, %v3468_v4  ;;  %v1267_v41 = vsel %vm43_vm0, %v1261_v35, %v3466_v3  ;;  %v1303_v42 = vsel %vm43_vm0, %v1297_v36, %v3466_v3  ;;  %v3133_v38 = vld [vmem:[%s4111_s3 + $0xd0] sm:$0xff]  }
  0x18   :  { %2655 = vmatpush.bf16.msra.mxu0 %v3376_v58  ;;  %3406 = vmatpush.bf16.msra.mxu2 %v3376_v58  ;;  %1213 = vst [vmem:[#allocation7 + $0x80] sm:$0xf] %v1210_v16  ;;  %v274_v43 = vpack.c.bf16 0.0, %v271_v39  ;;  %v310_v44 = vpack.c.bf16 0.0, %v307_v40  ;;  %v1279_v45 = vsel %vm3492_vm1, %v1267_v41, %v3468_v4  ;;  %v1315_v46 = vsel %vm3492_vm1, %v1303_v42, %v3468_v4  ;;  %v3343_v54 = vld [vmem:[#allocation7 + $0x8] sm:$0xff] }
  0x19   :  { %3407 = vmatpush.bf16.msra.mxu3 %v3376_v58  ;;  %1249 = vst [vmem:[#allocation7 + $0x84] sm:$0xf] %v1246_v17  ;;  %v1282_v47 = vpack.c.bf16 0.0, %v1279_v45  ;;  %v1318_v48 = vpack.c.bf16 0.0, %v1315_v46  ;;  %v649_v51 = vunpack.c.h.bf16 %v3097_v49  ;;  %v619_v52 = vsel %vm43_vm0, %v613_v50, %v3466_v3  ;;  %v3119_v49 = vld [vmem:[%s4111_s3 + $0x98] sm:$0xff]  }
  0x1a   :  { %3405 = vmatpush.bf16.msra.mxu1 %v3376_v58  ;;  %1789 = vst [vmem:[#allocation7 + $0xc0] sm:$0xf] %v1786_v31  ;;  %v3357_v55 = vld [vmem:[#allocation7 + $0x78] sm:$0xff]  ;;  %v631_v56 = vsel %vm3492_vm1, %v619_v52, %v3468_v4  ;;  %v3131_v58 = vld [vmem:[%s4111_s3 + $0xc8] sm:$0xff]   ;;  %v325_v11 = vunpack.c.l.bf16 %v3089_v6  ;;  %v361_v12 = vunpack.c.h.bf16 %v3089_v6  ;;  %v1333_v13 = vunpack.c.l.bf16 %v3117_v7 }
  0x1b   :  { %1825 = vst [vmem:[#allocation7 + $0xc4] sm:$0xf] %v1822_v32  ;;  %v655_v53 = vsel %vm43_vm0, %v649_v51, %v3466_v3  ;;  %v634_v60 = vpack.c.bf16 0.0, %v631_v56  ;;  %v1837_v62 = vunpack.c.l.bf16 %v3131_v58  ;;  %v1873_v63 = vunpack.c.h.bf16 %v3131_v58 }
  0x1c   :  { %2656 = vmatpush.bf16.msra.mxu0 %v3375_v10  ;;  %3409 = vmatpush.bf16.msra.mxu2 %v3375_v10  ;;  %v3365_v22 = vld [vmem:[#allocation7 + $0xb8] sm:$0xff]  ;;  %277 = vst [vmem:[#allocation7 + $0x18] sm:$0xf] %v274_v43  ;;  %v667_v57 = vsel %vm3492_vm1, %v655_v53, %v3468_v4  ;;  %v1369_v14 = vunpack.c.h.bf16 %v3117_v7  ;;  %v331_v16 = vsel %vm43_vm0, %v325_v11, %v3466_v3  ;;  %v685_v30 = vunpack.c.l.bf16 %v3099_v29  ;;  %v3101_v7 = vld [vmem:[%s4111_s3 + $0x50] sm:$0xff]  }
  0x1d   :  { %3410 = vmatpush.bf16.msra.mxu3 %v3375_v10  ;;  %313 = vst [vmem:[#allocation7 + $0x1c] sm:$0xf] %v310_v44  ;;  %v670_v61 = vpack.c.bf16 0.0, %v667_v57  ;;  %v1843_v0 = vsel %vm43_vm0, %v1837_v62, %v3466_v3  ;;  %v1879_v1 = vsel %vm43_vm0, %v1873_v63, %v3466_v3  ;;  %v367_v17 = vsel %vm43_vm0, %v361_v12, %v3466_v3 }
  0x1e   :  { %3408 = vmatpush.bf16.msra.mxu1 %v3375_v10  ;;  %1285 = vst [vmem:[#allocation7 + $0x88] sm:$0xf] %v1282_v47  ;;  %v1855_v2 = vsel %vm3492_vm1, %v1843_v0, %v3468_v4  ;;  %v1891_v5 = vsel %vm3492_vm1, %v1879_v1, %v3468_v4  ;;  %v1375_v21 = vsel %vm43_vm0, %v1369_v14, %v3466_v3  ;;  %v721_v31 = vunpack.c.h.bf16 %v3099_v29  ;;  %v3344_v34 = vld [vmem:[#allocation7 + $0x10] sm:$0xff]  ;;  %v3121_v29 = vld [vmem:[%s4111_s3 + $0xa0] sm:$0xff]  }
  0x1f   :  { %1321 = vst [vmem:[#allocation7 + $0x8c] sm:$0xf] %v1318_v48  ;;  %v1858_v8 = vpack.c.bf16 0.0, %v1855_v2  ;;  %v1894_v10 = vpack.c.bf16 0.0, %v1891_v5  ;;  %v1387_v25 = vsel %vm3492_vm1, %v1375_v21, %v3468_v4  ;;  %v691_v32 = vsel %vm43_vm0, %v685_v30, %v3466_v3  ;;  %v3091_v48 = vld [vmem:[%s4111_s3 + $0x28] sm:$0xff]  }
  0x20   :  { %2657 = vmatpush.bf16.msra.mxu0 %v3374_v18  ;;  %3412 = vmatpush.bf16.msra.mxu2 %v3374_v18  ;;  %637 = vst [vmem:[#allocation7 + $0x40] sm:$0xf] %v634_v60  ;;  %v1390_v27 = vpack.c.bf16 0.0, %v1387_v25  ;;  %v727_v33 = vsel %vm43_vm0, %v721_v31, %v3466_v3  ;;  %v3358_v35 = vld [vmem:[#allocation7 + $0x80] sm:$0xff]  ;;  %v703_v36 = vsel %vm3492_vm1, %v691_v32, %v3468_v4  ;;  %v1909_v42 = vunpack.c.l.bf16 %v3133_v38 }
  0x21   :  { %3413 = vmatpush.bf16.msra.mxu3 %v3374_v18  ;;  %673 = vst [vmem:[#allocation7 + $0x44] sm:$0xf] %v670_v61  ;;  %v739_v37 = vsel %vm3492_vm1, %v727_v33, %v3468_v4  ;;  %v706_v40 = vpack.c.bf16 0.0, %v703_v36  ;;  %v1945_v43 = vunpack.c.h.bf16 %v3133_v38  ;;  %v397_v52 = vunpack.c.l.bf16 %v3091_v48 }
  0x22   :  { %3411 = vmatpush.bf16.msra.mxu1 %v3374_v18  ;;  %v3366_v59 = vld [vmem:[#allocation7 + $0xc0] sm:$0xff]  ;;  %1861 = vst [vmem:[#allocation7 + $0xc8] sm:$0xf] %v1858_v8  ;;  %v343_v18 = vsel %vm3492_vm1, %v331_v16, %v3468_v4  ;;  %v742_v41 = vpack.c.bf16 0.0, %v739_v37  ;;  %v1915_v44 = vsel %vm43_vm0, %v1909_v42, %v3466_v3  ;;  %v433_v53 = vunpack.c.h.bf16 %v3091_v48 }
  0x23   :  { %2658 = vmatmul.bf16.vlgmr.msra.gmra.mxu0 %v3342_v19  ;;  %2728 = vmatmul.bf16.vlgmr.msra.gmra.mxu2 %v3356_v20  ;;  %1897 = vst [vmem:[#allocation7 + $0xcc] sm:$0xf] %v1894_v10  ;;  %v379_v19 = vsel %vm3492_vm1, %v367_v17, %v3468_v4  ;;  %v1339_v20 = vsel %vm43_vm0, %v1333_v13, %v3466_v3  ;;  %v757_v8 = vunpack.c.l.bf16 %v3101_v7  ;;  %v793_v10 = vunpack.c.h.bf16 %v3101_v7  ;;  %v3123_v7 = vld [vmem:[%s4111_s3 + $0xa8] sm:$0xff]  }
  0x24   :  { %2773 = vmatmul.bf16.vlgmr.msra.gmra.mxu3 %v3365_v22  ;;  %v346_v22 = vpack.c.bf16 0.0, %v343_v18  ;;  %v382_v23 = vpack.c.bf16 0.0, %v379_v19  ;;  %v1351_v24 = vsel %vm3492_vm1, %v1339_v20, %v3468_v4  ;;  %1393 = vst [vmem:[#allocation7 + $0x94] sm:$0xf] %v1390_v27  ;;  %v1951_v45 = vsel %vm43_vm0, %v1945_v43, %v3466_v3  ;;  %v3345_v13 = vld [vmem:[#allocation7 + $0x18] sm:$0xff] }
  0x25   :  { %v1354_v26 = vpack.c.bf16 0.0, %v1351_v24  ;;  %709 = vst [vmem:[#allocation7 + $0x48] sm:$0xf] %v706_v40  ;;  %v1927_v46 = vsel %vm3492_vm1, %v1915_v44, %v3468_v4  ;;  %v1963_v47 = vsel %vm3492_vm1, %v1951_v45, %v3468_v4  ;;  %v403_v56 = vsel %vm43_vm0, %v397_v52, %v3466_v3  ;;  %v3135_v18 = vld [vmem:[%s4111_s3 + $0xd8] sm:$0xff]  }
  0x26   :  { %349 = vst [vmem:[#allocation7 + $0x20] sm:$0xf] %v346_v22  ;;  %v1930_v50 = vpack.c.bf16 0.0, %v1927_v46  ;;  %v1966_v51 = vpack.c.bf16 0.0, %v1963_v47  ;;  %v439_v57 = vsel %vm43_vm0, %v433_v53, %v3466_v3  ;;  %v415_v58 = vsel %vm3492_vm1, %v403_v56, %v3468_v4  ;;  %v3359_v14 = vld [vmem:[#allocation7 + $0x88] sm:$0xff] }
  0x27   :  { %385 = vst [vmem:[#allocation7 + $0x24] sm:$0xf] %v382_v23  ;;  %v418_v62 = vpack.c.bf16 0.0, %v415_v58  ;;  %v763_v11 = vsel %vm43_vm0, %v757_v8, %v3466_v3  ;;  %v799_v12 = vsel %vm43_vm0, %v793_v10, %v3466_v3  ;;  %v1981_v22 = vunpack.c.l.bf16 %v3135_v18  ;;  %v3137_v58 = vld [vmem:[%s4111_s3 + $0xe0] sm:$0xff]  }
  0x28   :  { %v3350_v28 = vld [vmem:[#allocation7 + $0x40] sm:$0xff]  ;;  %1357 = vst [vmem:[#allocation7 + $0x90] sm:$0xf] %v1354_v26  ;;  %v775_v16 = vsel %vm3492_vm1, %v763_v11, %v3468_v4  ;;  %v811_v17 = vsel %vm3492_vm1, %v799_v12, %v3468_v4  ;;  %v2017_v23 = vunpack.c.h.bf16 %v3135_v18  ;;  %vm3068_vm7 = vcmp.eq.s32.totalorder %v3479_v9, 35 }
  0x29   :  { %2698 = vmatmul.bf16.vlgmr.msra.gmra.mxu1 %v3350_v28  ;;  %745 = vst [vmem:[#allocation7 + $0x4c] sm:$0xf] %v742_v41  ;;  %v778_v20 = vpack.c.bf16 0.0, %v775_v16  ;;  %v814_v21 = vpack.c.bf16 0.0, %v811_v17  ;;  %v1987_v24 = vsel %vm43_vm0, %v1981_v22, %v3466_v3  ;;  %v3093_v28 = vld [vmem:[%s4111_s3 + $0x30] sm:$0xff]   ;;  %vm3075_vm8 = vcmp.ge.s32.totalorder %v3479_v9, 32 }
  0x2a   :  { %v3367_v39 = vld [vmem:[#allocation7 + $0xc8] sm:$0xff]  ;;  %1933 = vst [vmem:[#allocation7 + $0xd0] sm:$0xf] %v1930_v50  ;;  %v2023_v25 = vsel %vm43_vm0, %v2017_v23, %v3466_v3  ;;  %v1999_v26 = vsel %vm3492_vm1, %v1987_v24, %v3468_v4  ;;  %v469_v32 = vunpack.c.l.bf16 %v3093_v28  ;;  %v505_v33 = vunpack.c.h.bf16 %v3093_v28 }
  0x2b   :  { %1969 = vst [vmem:[#allocation7 + $0xd4] sm:$0xf] %v1966_v51  ;;  %v2035_v27 = vsel %vm3492_vm1, %v2023_v25, %v3468_v4  ;;  %v2002_v30 = vpack.c.bf16 0.0, %v1999_v26 }
  0x2c   :  { %421 = vst [vmem:[#allocation7 + $0x28] sm:$0xf] %v418_v62  ;;  %v2038_v31 = vpack.c.bf16 0.0, %v2035_v27  ;;  %v475_v36 = vsel %vm43_vm0, %v469_v32, %v3466_v3  ;;  %v511_v37 = vsel %vm43_vm0, %v505_v33, %v3466_v3  ;;  %v2053_v62 = vunpack.c.l.bf16 %v3137_v58 }
  0x2d   :  { %781 = vst [vmem:[#allocation7 + $0x50] sm:$0xf] %v778_v20  ;;  %v487_v38 = vsel %vm3492_vm1, %v475_v36, %v3468_v4 }
  0x2e   :  { %817 = vst [vmem:[#allocation7 + $0x54] sm:$0xf] %v814_v21  ;;  %v490_v42 = vpack.c.bf16 0.0, %v487_v38  ;;  %v3139_v38 = vld [vmem:[%s4111_s3 + $0xe8] sm:$0xff]  }
  0x2f   :  { %2005 = vst [vmem:[#allocation7 + $0xd8] sm:$0xf] %v2002_v30 }
  0x30   :  { %v3351_v6 = vld [vmem:[#allocation7 + $0x48] sm:$0xff]  ;;  %2041 = vst [vmem:[#allocation7 + $0xdc] sm:$0xf] %v2038_v31 }
  0x31   :  { %493 = vst [vmem:[#allocation7 + $0x30] sm:$0xf] %v490_v42  ;;  %v2125_v42 = vunpack.c.l.bf16 %v3139_v38 }
  0x32   :  { %v3368_v19 = vld [vmem:[#allocation7 + $0xd0] sm:$0xff] }
  0x33   :  { %2663 = vmatmul.bf16.gmra.mxu0 %v3343_v54  ;;  %2733 = vmatmul.bf16.gmra.mxu2 %v3357_v55  ;;  %v1405_v54 = vunpack.c.l.bf16 %v3119_v49  ;;  %v1441_v55 = vunpack.c.h.bf16 %v3119_v49  ;;  %v3103_v49 = vld [vmem:[%s4111_s3 + $0x58] sm:$0xff]  }
  0x34   :  { %2778 = vmatmul.bf16.gmra.mxu3 %v3366_v59  ;;  %v451_v59 = vsel %vm3492_vm1, %v439_v57, %v3468_v4  ;;  %v829_v50 = vunpack.c.l.bf16 %v3103_v49  ;;  %v865_v51 = vunpack.c.h.bf16 %v3103_v49 }
  0x35   :  { %v1411_v60 = vsel %vm43_vm0, %v1405_v54, %v3466_v3  ;;  %v1447_v61 = vsel %vm43_vm0, %v1441_v55, %v3466_v3  ;;  %v454_v63 = vpack.c.bf16 0.0, %v451_v59  ;;  %v3352_v48 = vld [vmem:[#allocation7 + $0x50] sm:$0xff]  ;;  %v3346_v54 = vld [vmem:[#allocation7 + $0x20] sm:$0xff] }
  0x36   :  { %v1423_v0 = vsel %vm3492_vm1, %v1411_v60, %v3468_v4  ;;  %v1459_v1 = vsel %vm3492_vm1, %v1447_v61, %v3468_v4  ;;  %v835_v52 = vsel %vm43_vm0, %v829_v50, %v3466_v3  ;;  %v871_v53 = vsel %vm43_vm0, %v865_v51, %v3466_v3  ;;  %v3360_v55 = vld [vmem:[#allocation7 + $0x90] sm:$0xff] }
  0x37   :  { %v1426_v2 = vpack.c.bf16 0.0, %v1423_v0  ;;  %v1462_v5 = vpack.c.bf16 0.0, %v1459_v1  ;;  %457 = vst [vmem:[#allocation7 + $0x2c] sm:$0xf] %v454_v63  ;;  %v847_v56 = vsel %vm3492_vm1, %v835_v52, %v3468_v4  ;;  %v883_v57 = vsel %vm3492_vm1, %v871_v53, %v3468_v4  ;;  %v3369_v59 = vld [vmem:[#allocation7 + $0xd8] sm:$0xff] }
  0x38   :  { %v850_v60 = vpack.c.bf16 0.0, %v847_v56  ;;  %v886_v61 = vpack.c.bf16 0.0, %v883_v57  ;;  %v2089_v63 = vunpack.c.h.bf16 %v3137_v58  ;;  %v2059_v0 = vsel %vm43_vm0, %v2053_v62, %v3466_v3 }
  0x39   :  { %2703 = vmatmul.bf16.gmra.mxu1 %v3351_v6  ;;  %1429 = vst [vmem:[#allocation7 + $0x98] sm:$0xf] %v1426_v2  ;;  %v2071_v2 = vsel %vm3492_vm1, %v2059_v0, %v3468_v4  ;;  %v3095_v6 = vld [vmem:[%s4111_s3 + $0x38] sm:$0xff]  }
  0x3a   :  { %1465 = vst [vmem:[#allocation7 + $0x9c] sm:$0xf] %v1462_v5  ;;  %v2095_v1 = vsel %vm43_vm0, %v2089_v63, %v3466_v3  ;;  %v2074_v8 = vpack.c.bf16 0.0, %v2071_v2  ;;  %v541_v11 = vunpack.c.l.bf16 %v3095_v6  ;;  %v577_v12 = vunpack.c.h.bf16 %v3095_v6 }
  0x3b   :  { %853 = vst [vmem:[#allocation7 + $0x58] sm:$0xf] %v850_v60  ;;  %v2107_v5 = vsel %vm3492_vm1, %v2095_v1, %v3468_v4  ;;  %v3107_v60 = vld [vmem:[%s4111_s3 + $0x68] sm:$0xff]  }
  0x3c   :  { %889 = vst [vmem:[#allocation7 + $0x5c] sm:$0xf] %v886_v61  ;;  %v2110_v10 = vpack.c.bf16 0.0, %v2107_v5  ;;  %v547_v16 = vsel %vm43_vm0, %v541_v11, %v3466_v3  ;;  %v583_v17 = vsel %vm43_vm0, %v577_v12, %v3466_v3  ;;  %v973_v61 = vunpack.c.l.bf16 %v3107_v60 }
  0x3d   :  { %2077 = vst [vmem:[#allocation7 + $0xe0] sm:$0xf] %v2074_v8  ;;  %v559_v18 = vsel %vm3492_vm1, %v547_v16, %v3468_v4  ;;  %v1009_v62 = vunpack.c.h.bf16 %v3107_v60 }
  0x3e   :  { %2113 = vst [vmem:[#allocation7 + $0xe4] sm:$0xf] %v2110_v10  ;;  %v562_v22 = vpack.c.bf16 0.0, %v559_v18  ;;  %v979_v63 = vsel %vm43_vm0, %v973_v61, %v3466_v3 }
  0x3f   :  { %v1015_v0 = vsel %vm43_vm0, %v1009_v62, %v3466_v3  ;;  %v991_v5 = vsel %vm3492_vm1, %v979_v63, %v3468_v4 }
  0x40   :  { %565 = vst [vmem:[#allocation7 + $0x38] sm:$0xf] %v562_v22  ;;  %v1027_v6 = vsel %vm3492_vm1, %v1015_v0, %v3468_v4  ;;  %v994_v10 = vpack.c.bf16 0.0, %v991_v5 }
  0x41   :  { %v1030_v11 = vpack.c.bf16 0.0, %v1027_v6 }
  0x42   :  { %997 = vst [vmem:[#allocation7 + $0x68] sm:$0xf] %v994_v10 }
  0x43   :  { %2668 = vmatmul.bf16.gmra.mxu0 %v3344_v34  ;;  %2738 = vmatmul.bf16.gmra.mxu2 %v3358_v35  ;;  %v1477_v34 = vunpack.c.l.bf16 %v3121_v29  ;;  %v1513_v35 = vunpack.c.h.bf16 %v3121_v29  ;;  %v3353_v28 = vld [vmem:[#allocation7 + $0x58] sm:$0xff]  ;;  %v3105_v29 = vld [vmem:[%s4111_s3 + $0x60] sm:$0xff]   ;;  %1033 = vst [vmem:[#allocation7 + $0x6c] sm:$0xf] %v1030_v11 }
  0x44   :  { %2783 = vmatmul.bf16.gmra.mxu3 %v3367_v39  ;;  %v523_v39 = vsel %vm3492_vm1, %v511_v37, %v3468_v4  ;;  %v901_v30 = vunpack.c.l.bf16 %v3105_v29  ;;  %v937_v31 = vunpack.c.h.bf16 %v3105_v29 }
  0x45   :  { %v1483_v40 = vsel %vm43_vm0, %v1477_v34, %v3466_v3  ;;  %v1519_v41 = vsel %vm43_vm0, %v1513_v35, %v3466_v3  ;;  %v526_v43 = vpack.c.bf16 0.0, %v523_v39  ;;  %v3347_v34 = vld [vmem:[#allocation7 + $0x28] sm:$0xff]  ;;  %v3361_v35 = vld [vmem:[#allocation7 + $0x98] sm:$0xff]  ;;  %v3370_v39 = vld [vmem:[#allocation7 + $0xe0] sm:$0xff] }
  0x46   :  { %v1495_v44 = vsel %vm3492_vm1, %v1483_v40, %v3468_v4  ;;  %v1531_v45 = vsel %vm3492_vm1, %v1519_v41, %v3468_v4  ;;  %v907_v32 = vsel %vm43_vm0, %v901_v30, %v3466_v3  ;;  %v943_v33 = vsel %vm43_vm0, %v937_v31, %v3466_v3 }
  0x47   :  { %v1498_v46 = vpack.c.bf16 0.0, %v1495_v44  ;;  %v1534_v47 = vpack.c.bf16 0.0, %v1531_v45  ;;  %529 = vst [vmem:[#allocation7 + $0x34] sm:$0xf] %v526_v43  ;;  %v919_v36 = vsel %vm3492_vm1, %v907_v32, %v3468_v4  ;;  %v955_v37 = vsel %vm3492_vm1, %v943_v33, %v3468_v4 }
  0x48   :  { %v922_v40 = vpack.c.bf16 0.0, %v919_v36  ;;  %v958_v41 = vpack.c.bf16 0.0, %v955_v37  ;;  %v2161_v43 = vunpack.c.h.bf16 %v3139_v38  ;;  %v2131_v44 = vsel %vm43_vm0, %v2125_v42, %v3466_v3 }
  0x49   :  { %2708 = vmatmul.bf16.gmra.mxu1 %v3352_v48  ;;  %1501 = vst [vmem:[#allocation7 + $0xa0] sm:$0xf] %v1498_v46  ;;  %v2143_v46 = vsel %vm3492_vm1, %v2131_v44, %v3468_v4  ;;  %v3125_v48 = vld [vmem:[%s4111_s3 + $0xb0] sm:$0xff]  }
  0x4a   :  { %1537 = vst [vmem:[#allocation7 + $0xa4] sm:$0xf] %v1534_v47  ;;  %v2167_v45 = vsel %vm43_vm0, %v2161_v43, %v3466_v3  ;;  %v2146_v49 = vpack.c.bf16 0.0, %v2143_v46  ;;  %v1621_v51 = vunpack.c.l.bf16 %v3125_v48  ;;  %v1657_v52 = vunpack.c.h.bf16 %v3125_v48 }
  0x4b   :  { %925 = vst [vmem:[#allocation7 + $0x60] sm:$0xf] %v922_v40  ;;  %v2179_v47 = vsel %vm3492_vm1, %v2167_v45, %v3468_v4 }
  0x4c   :  { %961 = vst [vmem:[#allocation7 + $0x64] sm:$0xf] %v958_v41  ;;  %v2182_v50 = vpack.c.bf16 0.0, %v2179_v47  ;;  %v1627_v53 = vsel %vm43_vm0, %v1621_v51, %v3466_v3 }
  0x4d   :  { %2149 = vst [vmem:[#allocation7 + $0xe8] sm:$0xf] %v2146_v49 }
  0x4e   :  { %2185 = vst [vmem:[#allocation7 + $0xec] sm:$0xf] %v2182_v50  ;;  %v3348_v1 = vld [vmem:[#allocation7 + $0x30] sm:$0xff] }
  0x51   :  { %v3362_v2 = vld [vmem:[#allocation7 + $0xa0] sm:$0xff] }
  0x53   :  { %2673 = vmatmul.bf16.gmra.mxu0 %v3345_v13  ;;  %2743 = vmatmul.bf16.gmra.mxu2 %v3359_v14  ;;  %v1549_v13 = vunpack.c.l.bf16 %v3123_v7  ;;  %v1585_v14 = vunpack.c.h.bf16 %v3123_v7  ;;  %v3141_v7 = vld [vmem:[%s4111_s3 + $0xf0] sm:$0xff]  }
  0x54   :  { %2788 = vmatmul.bf16.gmra.mxu3 %v3368_v19  ;;  %v595_v19 = vsel %vm3492_vm1, %v583_v17, %v3468_v4  ;;  %v2197_v12 = vunpack.c.l.bf16 %v3141_v7 }
  0x55   :  { %v1555_v20 = vsel %vm43_vm0, %v1549_v13, %v3466_v3  ;;  %v1591_v21 = vsel %vm43_vm0, %v1585_v14, %v3466_v3  ;;  %v598_v23 = vpack.c.bf16 0.0, %v595_v19  ;;  %v3371_v8 = vld [vmem:[#allocation7 + $0xe8] sm:$0xff]  ;;  %v2233_v13 = vunpack.c.h.bf16 %v3141_v7 }
  0x56   :  { %v1567_v24 = vsel %vm3492_vm1, %v1555_v20, %v3468_v4  ;;  %v1603_v25 = vsel %vm3492_vm1, %v1591_v21, %v3468_v4  ;;  %v2203_v14 = vsel %vm43_vm0, %v2197_v12, %v3466_v3  ;;  %v3355_v21 = vld [vmem:[#allocation7 + $0x68] sm:$0xff] }
  0x57   :  { %v1570_v26 = vpack.c.bf16 0.0, %v1567_v24  ;;  %v1606_v27 = vpack.c.bf16 0.0, %v1603_v25  ;;  %601 = vst [vmem:[#allocation7 + $0x3c] sm:$0xf] %v598_v23  ;;  %v2239_v16 = vsel %vm43_vm0, %v2233_v13, %v3466_v3  ;;  %v2215_v17 = vsel %vm3492_vm1, %v2203_v14, %v3468_v4  ;;  %v3143_v24 = vld [vmem:[%s4111_s3 + $0xf8] sm:$0xff]  }
  0x58   :  { %v2251_v18 = vsel %vm3492_vm1, %v2239_v16, %v3468_v4  ;;  %v2218_v19 = vpack.c.bf16 0.0, %v2215_v17 }
  0x59   :  { %2713 = vmatmul.bf16.gmra.mxu1 %v3353_v28  ;;  %1573 = vst [vmem:[#allocation7 + $0xa8] sm:$0xf] %v1570_v26  ;;  %v2254_v20 = vpack.c.bf16 0.0, %v2251_v18  ;;  %v2269_v26 = vunpack.c.l.bf16 %v3143_v24  ;;  %v3389_v18 = vld [vmem:[%s4109_s1 + $0x38] sm:$0xff] }
  0x5a   :  { %1609 = vst [vmem:[#allocation7 + $0xac] sm:$0xf] %v1606_v27  ;;  %v2305_v27 = vunpack.c.h.bf16 %v3143_v24  ;;  %3029 = vmatpush.bf16.msrb.mxu1 %v3389_v18 }
  0x5b   :  { %2221 = vst [vmem:[#allocation7 + $0xf0] sm:$0xf] %v2218_v19  ;;  %v2275_v28 = vsel %vm43_vm0, %v2269_v26, %v3466_v3 }
  0x5c   :  { %2257 = vst [vmem:[#allocation7 + $0xf4] sm:$0xf] %v2254_v20  ;;  %v2311_v29 = vsel %vm43_vm0, %v2305_v27, %v3466_v3  ;;  %v2287_v30 = vsel %vm3492_vm1, %v2275_v28, %v3468_v4 }
  0x5d   :  { %v2323_v31 = vsel %vm3492_vm1, %v2311_v29, %v3468_v4  ;;  %v2290_v32 = vpack.c.bf16 0.0, %v2287_v30 }
  0x5e   :  { %v3349_v22 = vld [vmem:[#allocation7 + $0x38] sm:$0xff]  ;;  %v2326_v33 = vpack.c.bf16 0.0, %v2323_v31 }
  0x5f   :  { %2293 = vst [vmem:[#allocation7 + $0xf8] sm:$0xf] %v2290_v32 }
  0x60   :  { %2329 = vst [vmem:[#allocation7 + $0xfc] sm:$0xf] %v2326_v33 }
  0x61   :  { %v3363_v23 = vld [vmem:[#allocation7 + $0xa8] sm:$0xff] }
  0x63   :  { %2678 = vmatmul.bf16.gmra.mxu0 %v3346_v54  ;;  %2748 = vmatmul.bf16.gmra.mxu2 %v3360_v55  ;;  %v1663_v54 = vsel %vm43_vm0, %v1657_v52, %v3466_v3  ;;  %v1639_v55 = vsel %vm3492_vm1, %v1627_v53, %v3468_v4  ;;  %v3372_v25 = vld [vmem:[#allocation7 + $0xf0] sm:$0xff] }
  0x64   :  { %2793 = vmatmul.bf16.gmra.mxu3 %v3369_v59  ;;  %v1675_v56 = vsel %vm3492_vm1, %v1663_v54, %v3468_v4  ;;  %v1642_v57 = vpack.c.bf16 0.0, %v1639_v55  ;;  %v3354_v59 = vld [vmem:[#allocation7 + $0x60] sm:$0xff] }
  0x65   :  { %v1678_v58 = vpack.c.bf16 0.0, %v1675_v56 }
  0x66   :  { %1645 = vst [vmem:[#allocation7 + $0xb0] sm:$0xf] %v1642_v57 }
  0x67   :  { %1681 = vst [vmem:[#allocation7 + $0xb4] sm:$0xf] %v1678_v58  ;;  %v3373_v36 = vld [vmem:[#allocation7 + $0xf8] sm:$0xff] }
  0x69   :  { %2718 = vmatmul.bf16.gmra.mxu1 %v3354_v59 }
  0x73   :  { %2683 = vmatmul.bf16.gmra.mxu0 %v3347_v34  ;;  %2753 = vmatmul.bf16.gmra.mxu2 %v3361_v35  ;;  %v3364_v34 = vld [vmem:[#allocation7 + $0xb0] sm:$0xff] }
  0x74   :  { %2798 = vmatmul.bf16.gmra.mxu3 %v3370_v39 }
  0x79   :  { %2723 = vmatmul.bf16.gmra.mxu1 %v3355_v21 }
  0x83   :  { %2688 = vmatmul.bf16.gmra.mxu0 %v3348_v1  ;;  %2758 = vmatmul.bf16.gmra.mxu2 %v3362_v2 }
  0x84   :  { %2803 = vmatmul.bf16.gmra.mxu3 %v3371_v8 }
  0x93   :  { %2693 = vmatmul.bf16.gmra.mxu0 %v3349_v22  ;;  %2763 = vmatmul.bf16.gmra.mxu2 %v3363_v23  ;;  %v3388_v23 = vld [vmem:[%s4109_s1 + $0x30] sm:$0xff] }
  0x94   :  { %2808 = vmatmul.bf16.gmra.mxu3 %v3372_v25  ;;  %3030 = vmatpush.bf16.msrb.mxu1 %v3388_v23 }
  0xa0   :  { %v2659_v35 = vpop.f32.mrf.mxu0 }
  0xa1   :  { %v2819_v37 = vmax.f32 %v2659_v35, 0.0 }
  0xa3   :  { %2768 = vmatmul.bf16.gmra.mxu2 %v3364_v34 }
  0xa4   :  { %2813 = vmatmul.bf16.gmra.mxu3 %v3373_v36 }
  0xa6   :  { %v3982_v3 = vpop.f32.mrf.mxu2  ;;  %v3996_v51 = vpop.f32.mrf.mxu1 }
  0xa7   :  { %v3984_v38 = vpop.f32.mrf.mxu3 }
  0xa8   :  { %v2661_v39 = vpop.f32.mrf.mxu0 }
  0xa9   :  { %v2820_v40 = vmax.f32 %v2661_v39, 0.0 }
  0xab   :  { %v2883_v41 = vadd.f32 %v2820_v40, %v2819_v37 }
  0xae   :  { %v3986_v15 = vpop.f32.mrf.mxu2  ;;  %v4000_v58 = vpop.f32.mrf.mxu1 }
  0xaf   :  { %v3988_v42 = vpop.f32.mrf.mxu3 }
  0xb0   :  { %v2664_v4 = vpop.f32.mrf.mxu0 }
  0xb1   :  { %v2821_v43 = vmax.f32 %v2664_v4, 0.0 }
  0xb3   :  { %v2884_v44 = vadd.f32 %v2883_v41, %v2821_v43 }
  0xb6   :  { %v3990_v45 = vpop.f32.mrf.mxu2  ;;  %v4004_v1 = vpop.f32.mrf.mxu1 }
  0xb7   :  { %v3992_v48 = vpop.f32.mrf.mxu3 }
  0xb8   :  { %v2666_v46 = vpop.f32.mrf.mxu0 }
  0xb9   :  { %v2822_v47 = vmax.f32 %v2666_v46, 0.0 }
  0xbb   :  { %v2885_v49 = vadd.f32 %v2884_v44, %v2822_v47  ;;  %v3387_v47 = vld [vmem:[%s4109_s1 + $0x28] sm:$0xff] }
  0xbc   :  { %3031 = vmatpush.bf16.msrb.mxu1 %v3387_v47 }
  0xbe   :  { %v3994_v50 = vpop.f32.mrf.mxu2  ;;  %v4010_v10 = vpop.f32.mrf.mxu1 }
  0xbf   :  { %v3998_v55 = vpop.f32.mrf.mxu3 }
  0xc0   :  { %v2669_v52 = vpop.f32.mrf.mxu0 }
  0xc1   :  { %v2823_v53 = vmax.f32 %v2669_v52, 0.0 }
  0xc3   :  { %v2886_v54 = vadd.f32 %v2885_v49, %v2823_v53 }
  0xc6   :  { %v2739_v56 = vpop.f32.mrf.mxu2  ;;  %v4016_v16 = vpop.f32.mrf.mxu1 }
  0xc7   :  { %v4002_v60 = vpop.f32.mrf.mxu3  ;;  %v2851_v61 = vmax.f32 %v2739_v56, 0.0 }
  0xc8   :  { %v2671_v57 = vpop.f32.mrf.mxu0 }
  0xc9   :  { %v2824_v31 = vmax.f32 %v2671_v57, 0.0 }
  0xcb   :  { %v2887_v35 = vadd.f32 %v2886_v54, %v2824_v31 }
  0xce   :  { %v2741_v59 = vpop.f32.mrf.mxu2  ;;  %v4025_v22 = vpop.f32.mrf.mxu1 }
  0xcf   :  { %v2852_v62 = vmax.f32 %v2741_v59, 0.0  ;;  %v4006_v7 = vpop.f32.mrf.mxu3 }
  0xd0   :  { %v2674_v63 = vpop.f32.mrf.mxu0 }
  0xd1   :  { %v2920_v0 = vadd.f32 %v2852_v62, %v2851_v61  ;;  %v2825_v33 = vmax.f32 %v2674_v63, 0.0  ;;  %v3386_v61 = vld [vmem:[%s4109_s1 + $0x20] sm:$0xff] }
  0xd2   :  { %3032 = vmatpush.bf16.msrb.mxu1 %v3386_v61 }
  0xd3   :  { %v2888_v39 = vadd.f32 %v2887_v35, %v2825_v33 }
  0xd6   :  { %v2744_v2 = vpop.f32.mrf.mxu2  ;;  %v4034_v27 = vpop.f32.mrf.mxu1 }
  0xd7   :  { %v2853_v5 = vmax.f32 %v2744_v2, 0.0  ;;  %v4012_v13 = vpop.f32.mrf.mxu3 }
  0xd8   :  { %v2676_v6 = vpop.f32.mrf.mxu0 }
  0xd9   :  { %v4008_v8 = vadd.f32 %v2920_v0, %v2853_v5  ;;  %v2826_v36 = vmax.f32 %v2676_v6, 0.0 }
  0xdb   :  { %v2889_v4 = vadd.f32 %v2888_v39, %v2826_v36  ;;  %v2836_v36 = vmax.f32 %v4000_v58, 0.0 }
  0xde   :  { %v2746_v11 = vpop.f32.mrf.mxu2  ;;  %v4040_v32 = vpop.f32.mrf.mxu1 }
  0xdf   :  { %v4021_v19 = vpop.f32.mrf.mxu3 }
  0xe0   :  { %v2679_v12 = vpop.f32.mrf.mxu0 }
  0xe1   :  { %v2827_v40 = vmax.f32 %v2679_v12, 0.0 }
  0xe3   :  { %v2890_v44 = vadd.f32 %v2889_v4, %v2827_v40 }
  0xe6   :  { %v4014_v14 = vpop.f32.mrf.mxu2  ;;  %v4047_v52 = vpop.f32.mrf.mxu1 }
  0xe7   :  { %v4032_v25 = vpop.f32.mrf.mxu3  ;;  %v2855_v31 = vmax.f32 %v4014_v14, 0.0  ;;  %v2838_v14 = vmax.f32 %v4010_v10, 0.0 }
  0xe8   :  { %v2681_v17 = vpop.f32.mrf.mxu0 }
  0xe9   :  { %v2828_v43 = vmax.f32 %v2681_v17, 0.0 }
  0xeb   :  { %v2891_v53 = vadd.f32 %v2890_v44, %v2828_v43 }
  0xee   :  { %v4023_v20 = vpop.f32.mrf.mxu2  ;;  %v2721_v18 = vpop.f32.mrf.mxu1 }
  0xef   :  { %v4038_v30 = vpop.f32.mrf.mxu3 }
  0xf0   :  { %v2684_v21 = vpop.f32.mrf.mxu0 }
  0xf1   :  { %v2829_v46 = vmax.f32 %v2684_v21, 0.0  ;;  %v2854_v21 = vmax.f32 %v2746_v11, 0.0  ;;  %v2837_v11 = vmax.f32 %v4004_v1, 0.0 }
  0xf3   :  { %v2892_v57 = vadd.f32 %v2891_v53, %v2829_v46  ;;  %v2922_v35 = vadd.f32 %v4008_v8, %v2854_v21 }
  0xf5   :  { %v2923_v43 = vadd.f32 %v2922_v35, %v2855_v31 }
  0xf6   :  { %v4030_v24 = vpop.f32.mrf.mxu2  ;;  %v2724_v53 = vpop.f32.mrf.mxu1 }
  0xf7   :  { %v4042_v41 = vpop.f32.mrf.mxu3  ;;  %v2857_v44 = vmax.f32 %v4030_v24, 0.0 }
  0xf8   :  { %v2686_v26 = vpop.f32.mrf.mxu0 }
  0xf9   :  { %v2830_v56 = vmax.f32 %v2686_v26, 0.0 }
  0xfb   :  { %v2893_v62 = vadd.f32 %v2892_v57, %v2830_v56 }
  0xfe   :  { %v4036_v28 = vpop.f32.mrf.mxu2 }
  0xff   :  { %v4052_v0 = vpop.f32.mrf.mxu3  ;;  %v2858_v47 = vmax.f32 %v4036_v28, 0.0  ;;  %v2842_v28 = vmax.f32 %v4040_v32, 0.0 }
 0x100   :  { %v2689_v29 = vpop.f32.mrf.mxu0 }
 0x101   :  { %v2831_v59 = vmax.f32 %v2689_v29, 0.0  ;;  %v2835_v29 = vmax.f32 %v3996_v51, 0.0 }
 0x103   :  { %v2894_v2 = vadd.f32 %v2893_v62, %v2831_v59  ;;  %v2840_v59 = vmax.f32 %v4025_v22, 0.0  ;;  %v2844_v22 = vmax.f32 %v2721_v18, 0.0 }
 0x106   :  { %v2759_v34 = vpop.f32.mrf.mxu2 }
 0x107   :  { %v4059_v4 = vpop.f32.mrf.mxu3  ;;  %v2859_v56 = vmax.f32 %v2759_v34, 0.0 }
 0x108   :  { %v2691_v37 = vpop.f32.mrf.mxu0 }
 0x109   :  { %v2832_v63 = vmax.f32 %v2691_v37, 0.0  ;;  %v2856_v37 = vmax.f32 %v4023_v20, 0.0  ;;  %v2839_v20 = vmax.f32 %v4016_v16, 0.0  ;;  %v2843_v16 = vmax.f32 %v4047_v52, 0.0 }
 0x10a   :  { %v2865_v52 = vmax.f32 %v3984_v38, 0.0 }
 0x10b   :  { %v2895_v12 = vadd.f32 %v2894_v2, %v2832_v63  ;;  %v2924_v51 = vadd.f32 %v2923_v43, %v2856_v37  ;;  %v2841_v63 = vmax.f32 %v4034_v27, 0.0  ;;  %v3385_v37 = vld [vmem:[%s4109_s1 + $0x18] sm:$0xff]  ;;  %v2847_v43 = vmax.f32 %v3982_v3, 0.0 }
 0x10c   :  { %3033 = vmatpush.bf16.msrb.mxu1 %v3385_v37 }
 0x10d   :  { %v2925_v58 = vadd.f32 %v2924_v51, %v2857_v44  ;;  %v3384_v51 = vld [vmem:[%s4109_s1 + $0x10] sm:$0xff] }
 0x10e   :  { %v2761_v49 = vpop.f32.mrf.mxu2 }
 0x10f   :  { %v2926_v57 = vadd.f32 %v2925_v58, %v2858_v47  ;;  %v2860_v61 = vmax.f32 %v2761_v49, 0.0  ;;  %v2867_v47 = vmax.f32 %v3992_v48, 0.0  ;;  %v2868_v58 = vmax.f32 %v3998_v55, 0.0 }
 0x110   :  { %v2694_v54 = vpop.f32.mrf.mxu0  ;;  %3034 = vmatpush.bf16.msrb.mxu1 %v3384_v51  ;;  %v2872_v55 = vmax.f32 %v4021_v19, 0.0 }
 0x111   :  { %v2833_v5 = vmax.f32 %v2694_v54, 0.0  ;;  %v2927_v24 = vadd.f32 %v2926_v57, %v2859_v56  ;;  %v2869_v56 = vmax.f32 %v4002_v60, 0.0 }
 0x113   :  { %v2896_v23 = vadd.f32 %v2895_v12, %v2833_v5  ;;  %v4069_v5 = vpop.f32.mrf.mxu3  ;;  %v2928_v12 = vadd.f32 %v2927_v24, %v2860_v61 }
 0x116   :  { %v2764_v6 = vpop.f32.mrf.mxu2 }
 0x117   :  { %v2861_v2 = vmax.f32 %v2764_v6, 0.0 }
 0x118   :  { %v2696_v17 = vpop.f32.mrf.mxu0 }
 0x119   :  { %v2834_v26 = vmax.f32 %v2696_v17, 0.0  ;;  %v2929_v21 = vadd.f32 %v2928_v12, %v2861_v2  ;;  %v2876_v12 = vmax.f32 %v4052_v0, 0.0 }
 0x11b   :  { %v2897_v33 = vadd.f32 %v2896_v23, %v2834_v26  ;;  %v2726_v26 = vpop.f32.mrf.mxu1  ;;  %v2809_v18 = vpop.f32.mrf.mxu3 }
 0x11c   :  { %v2846_v32 = vmax.f32 %v2726_v26, 0.0 }
 0x11d   :  { %v2898_v39 = vadd.f32 %v2897_v33, %v2835_v29  ;;  %v2845_v33 = vmax.f32 %v2724_v53, 0.0  ;;  %v2849_v53 = vmax.f32 %v3990_v45, 0.0  ;;  %v3383_v45 = vld [vmem:[%s4109_s1 + $0x8] sm:$0xff] }
 0x11e   :  { %v2766_v40 = vpop.f32.mrf.mxu2  ;;  %3035 = vmatpush.bf16.msrb.mxu1 %v3383_v45 }
 0x11f   :  { %v2899_v46 = vadd.f32 %v2898_v39, %v2836_v36  ;;  %v2862_v17 = vmax.f32 %v2766_v40, 0.0 }
 0x121   :  { %v2900_v8 = vadd.f32 %v2899_v46, %v2837_v11  ;;  %v2930_v31 = vadd.f32 %v2929_v21, %v2862_v17  ;;  %v2866_v11 = vmax.f32 %v3988_v42, 0.0  ;;  %v2850_v42 = vmax.f32 %v3994_v50, 0.0 }
 0x122   :  { %v2873_v50 = vmax.f32 %v4032_v25, 0.0  ;;  %v2878_v25 = vmax.f32 %v4069_v5, 0.0 }
 0x123   :  { %v2901_v54 = vadd.f32 %v2900_v8, %v2838_v14  ;;  %v2848_v14 = vmax.f32 %v3986_v15, 0.0  ;;  %v2811_v48 = vpop.f32.mrf.mxu3 }
 0x125   :  { %v2902_v1 = vadd.f32 %v2901_v54, %v2839_v20 }
 0x126   :  { %v2769_v62 = vpop.f32.mrf.mxu2 }
 0x127   :  { %v2903_v10 = vadd.f32 %v2902_v1, %v2840_v59  ;;  %v2863_v49 = vmax.f32 %v2769_v62, 0.0  ;;  %v2870_v59 = vmax.f32 %v4006_v7, 0.0  ;;  %v2871_v1 = vmax.f32 %v4012_v13, 0.0  ;;  %v3382_v7 = vld [vmem:[%s4109_s1] sm:$0xff]  ;;  %s3420_s1 = smov 127  }
 0x128   :  { %3036 = vmatpush.bf16.msrb.mxu1 %v3382_v7  ;;  %v2875_v13 = vmax.f32 %v4042_v41, 0.0 }
 0x129   :  { %v2904_v34 = vadd.f32 %v2903_v10, %v2841_v63  ;;  %v2931_v35 = vadd.f32 %v2930_v31, %v2863_v49  ;;  %v2874_v63 = vmax.f32 %v4038_v30, 0.0  ;;  %v2880_v30 = vmax.f32 %v2811_v48, 0.0 }
 0x12b   :  { %v2905_v23 = vadd.f32 %v2904_v34, %v2842_v28  ;;  %v2814_v28 = vpop.f32.mrf.mxu3 }
 0x12c   :  { %v2881_v41 = vmax.f32 %v2814_v28, 0.0 }
 0x12d   :  { %v2906_v29 = vadd.f32 %v2905_v23, %v2843_v16  ;;  %v2877_v16 = vmax.f32 %v4059_v4, 0.0  ;;  %v2879_v23 = vmax.f32 %v2809_v18, 0.0 }
 0x12e   :  { %v2771_v27 = vpop.f32.mrf.mxu2 }
 0x12f   :  { %v2907_v6 = vadd.f32 %v2906_v29, %v2844_v22  ;;  %v2864_v36 = vmax.f32 %v2771_v27, 0.0 }
 0x131   :  { %v2908_v39 = vadd.f32 %v2907_v6, %v2845_v33  ;;  %v2932_v40 = vadd.f32 %v2931_v35, %v2864_v36 }
 0x133   :  { %v2933_v44 = vadd.f32 %v2932_v40, %v2865_v52  ;;  %v2909_v46 = vadd.f32 %v2908_v39, %v2846_v32  ;;  %v2816_v26 = vpop.f32.mrf.mxu3 }
 0x134   :  { %v2882_v27 = vmax.f32 %v2816_v26, 0.0 }
 0x135   :  { %v2934_v8 = vadd.f32 %v2933_v44, %v2866_v11  ;;  %v2910_v38 = vadd.f32 %v2909_v46, %v2847_v43  ;;  %v3419_v44 = vmov 0.0  }
 0x137   :  { %v2935_v3 = vadd.f32 %v2934_v8, %v2867_v47  ;;  %v2911_v20 = vadd.f32 %v2910_v38, %v2848_v14  ;;  %v3421_v14 = vmov 20  }
 0x138   :  { %3418 = vset.pattern.permute.xlu1 %v3421_v14  ;;  %3417 = vset.pattern.permute.xlu0 %v3421_v14 }
 0x139   :  { %v2936_v54 = vadd.f32 %v2935_v3, %v2868_v58  ;;  %v2912_v57 = vadd.f32 %v2911_v20, %v2849_v53 }
 0x13b   :  { %v2937_v15 = vadd.f32 %v2936_v54, %v2869_v56  ;;  %v2913_v61 = vadd.f32 %v2912_v57, %v2850_v42  ;;  %v3058_v56 = vcvt.s32.f32 %v3479_v9 }
 0x13d   :  { %v2938_v62 = vadd.f32 %v2937_v15, %v2870_v59  ;;  %v2914_v21 = vrot.slane %v2913_v61, 4 }
 0x13f   :  { %v2939_v24 = vadd.f32 %v2938_v62, %v2871_v1  ;;  %v2915_v29 = vadd.f32 %v2914_v21, %v2913_v61 }
 0x141   :  { %v2940_v60 = vadd.f32 %v2939_v24, %v2872_v55  ;;  %v2916_v6 = vrot.slane %v2915_v29, 2 }
 0x143   :  { %v2941_v2 = vadd.f32 %v2940_v60, %v2873_v50  ;;  %v2917_v4 = vadd.f32 %v2916_v6, %v2915_v29 }
 0x145   :  { %v2942_v10 = vadd.f32 %v2941_v2, %v2874_v63  ;;  %v2918_v5 = vrot.slane %v2917_v4, 1 }
 0x147   :  { %v2943_v19 = vadd.f32 %v2942_v10, %v2875_v13  ;;  %v2919_v40 = vadd.f32 %v2918_v5, %v2917_v4 }
 0x149   :  { %v2944_v34 = vadd.f32 %v2943_v19, %v2876_v12 }
 0x14b   :  { %v2945_v17 = vadd.f32 %v2944_v34, %v2877_v16 }
 0x14d   :  { %v2946_v22 = vadd.f32 %v2945_v17, %v2878_v25 }
 0x14f   :  { %v2947_v49 = vadd.f32 %v2946_v22, %v2879_v23 }
 0x151   :  { %v2948_v31 = vadd.f32 %v2947_v49, %v2880_v30 }
 0x153   :  { %v2949_v33 = vadd.f32 %v2948_v31, %v2881_v41 }
 0x155   :  { %v2950_v0 = vadd.f32 %v2949_v33, %v2882_v27 }
 0x157   :  { %v2951_v35 = vrot.slane %v2950_v0, 4 }
 0x159   :  { %v2952_v36 = vadd.f32 %v2951_v35, %v2950_v0 }
 0x15b   :  { %v2953_v32 = vrot.slane %v2952_v36, 2 }
 0x15d   :  { %v2954_v37 = vadd.f32 %v2953_v32, %v2952_v36 }
 0x15f   :  { %v2955_v52 = vrot.slane %v2954_v37, 1 }
 0x161   :  { %v2956_v39 = vadd.f32 %v2955_v52, %v2954_v37 }
 0x163   :  { %v2960_v18 = vsel %vm2959_vm2, %v2956_v39, %v2919_v40 }
 0x164   :  { %v3338_v43 = vpack.c.bf16 %v2960_v18, %v2960_v18 }
 0x166   :  { %3339 = vmatmul.msk.bf16.vlgmr.msrb.gmra.mxu1 %vm3337_vm4, %v3338_v43 }
 0x1e3   :  { %v3038_v11 = vpop.f32.mrf.mxu1 }
 0x1e4   :  { %vm3042_vm5 = vcmp.ge.f32.partialorder %v3038_v11, 0.0 }
 0x1e5   :  { %v3340_v46 = vsel %vm3042_vm5, 1.0, %v3419_v44 }
 0x1e6   :  { %3048 = vrot.lane.b32.xlu0 %v3340_v46, %s3420_s1  ;;  %v3046_v47 = vsub.f32 1.0, %v3340_v46  ;;  %v3045_v53 = vadd.f32 -1.0, %v3340_v46 }
 0x1eb   :  { %v3040_v51 = vpop.f32.mrf.mxu1 }
 0x258   :  { %v3049_v8 = vpop.permute.xlu0 %3048 }
 0x259   :  { %v3051_v38 = vmul.f32 %v3049_v8, %v3046_v47 }
 0x25b   :  { %v3052_v58 = vmul.f32 2.0, %v3051_v38 }
 0x25d   :  { %v3053_v3 = vadd.f32 %v3052_v58, %v3045_v53 }
 0x25f   :  { %3071 = vperm.xlu1 %3418, %v3053_v3   ;;  %vm3054_vm6 = vcmp.lt.f32.partialorder %v3053_v3, 0.0 }
 0x260   :  { %v3055_v20 = vsel %vm3054_vm6, 2.0, %v3053_v3 }
 0x261   :  { %v3059_v42 = vadd.f32 32.0, %v3055_v20 }
 0x263   :  { %3062 = vperm.xlu0 %3417, %v3059_v42  }
 0x2d1   :  { %v3072_v57 = vpop.permute.xlu1 %3071 }
 0x2d5   :  { %v3063_v54 = vpop.permute.xlu0 %3062 }
 0x2d6   :  { %vm3065_vm9 = vcmp.eq.f32.partialorder %v3058_v56, %v3063_v54 }
 0x2d7   :  { %v3341_v59 = vsel %vm3065_vm9, 1.0, %v3419_v44 }
 0x2d8   :  { %v3074_v15 = vsel %vm3068_vm7, %v3072_v57, %v3341_v59 }
 0x2d9   :  { %v3076_v61 = vsel %vm3075_vm8, %v3074_v15, %v3038_v11 }
 0x2da   :  { %3077 = vst [vmem:[%s4114_s6] sm:$0xff] %v3076_v61 }

</bundles_post_ra>
